<compile_context>
chip_gen: v7x
topology: tpu7x:2x2x1
jax: 0.10.0
libtpu: 0.0.40
codegen_flags: <defaults>
</compile_context>

<pallas_src>
import jax
import jax.numpy as jnp
from jax.experimental import pallas as pl
from jax.experimental.pallas import tpu as pltpu


def _round_up(x, m):
    return ((x + m - 1) // m) * m


def _receiver_kernel(cand_ref, signal_ref, w1bd_ref, b1_ref, wv_ref, wc_ref,
                     out_ref):
    """One batch-tile of the fused receiver forward.

    cand_ref   : (TB, G*D)   compute dtype (candidates packed batch-major)
    signal_ref : (TB, E)     compute dtype
    w1bd_ref   : (G*D, G*H)  compute dtype (block-diagonal encoder W1)
    b1_ref     : (1, G*H)    f32           (encoder b1, tiled G times)
    wv_ref     : (E, G*H)    compute dtype (Wlin2 @ W2^T, tiled G times)
    wc_ref     : (1, E)      f32           (Wlin2 @ b2)
    out_ref    : (TB, G)     f32
    """
    G = out_ref.shape[1]
    GH = w1bd_ref.shape[1]
    H = GH // G

    # Encoder first layer for all G candidates in ONE matmul; f32 accumulation.
    h = jnp.dot(cand_ref[...], w1bd_ref[...],
                preferred_element_type=jnp.float32) + b1_ref[...]   # (TB, G*H)
    h = jnp.maximum(h, 0.0)                                         # ReLU (f32)

    # Hoisted "score vector": v_rep[b, g*H:(g+1)*H] = (h_s @ W2^T)[b, :].
    v_rep = jnp.dot(signal_ref[...], wv_ref[...],
                    preferred_element_type=jnp.float32)             # (TB, G*H)

    # Hoisted bias term: c[b] = h_s[b,:] · b2 = signal[b,:] · (Wlin2 @ b2).
    c = jnp.sum(signal_ref[...].astype(jnp.float32) * wc_ref[...],
                axis=1, keepdims=True)                              # (TB, 1)

    hv = h * v_rep                                                  # (TB, G*H)

    # Per-group lane reduction -> (TB, G) scores, then the shared bias term.
    parts = [jnp.sum(hv[:, g * H:(g + 1) * H], axis=1, keepdims=True)
             for g in range(G)]                                     # G x (TB,1)
    out_ref[...] = (jnp.concatenate(parts, axis=1) + c).astype(out_ref.dtype)


def symbolic_receiver_mlp(signal, candidates, params, *,
                          compute_dtype=jnp.bfloat16, block_b=1024):
    """JAX wrapper mirroring SymbolicReceiverMLP.forward.

    signal     : (B, E) or (B, E, 1)
    candidates : (G, B, D) array, or a list of G arrays of shape (B, D)
    params     : dict with w1 (D,H), b1 (H,), w2 (H,H), b2 (H,), wlin2 (E,H)
                 (all pre-transposed to (in, out) relative to torch weights)
    returns    : scores / "log_probs" of shape (B, G), float32
    """
    if isinstance(candidates, (list, tuple)):
        candidates = jnp.stack(candidates, axis=0)                  # (G, B, D)
    if signal.ndim == 3:  # mirrors `signal.squeeze(dim=-1)` for 3-D input
        signal = jnp.squeeze(signal, axis=-1)

    G, B, D = candidates.shape
    E = signal.shape[1]
    H = params["w1"].shape[1]
    GD, GH = G * D, G * H

    # ---- batch tiling ----------------------------------------------------
    b8 = _round_up(B, 8)
    # Cap so G*tb stays VMEM-friendly (matters on v7x's 64 MiB VMEM).
    tb_cap = max(8, (8192 // max(G, 1)) // 8 * 8)
    if b8 <= block_b:
        # Small batch: prefer >=2 grid steps so both v7x TensorCores get work.
        tb = _round_up(b8 // 2, 8) if b8 >= 16 else b8
    else:
        tb = min(block_b, tb_cap)
    b_pad = _round_up(b8, tb)
    grid = (b_pad // tb,)

    # ---- weight precomputation (f32, once) --------------------------------
    w1_f = params["w1"].astype(jnp.float32)
    b1_f = params["b1"].astype(jnp.float32)
    w2_f = params["w2"].astype(jnp.float32)
    b2_f = params["b2"].astype(jnp.float32)
    wlin2_f = params["wlin2"].astype(jnp.float32)

    w1_bd = jnp.kron(jnp.eye(G, dtype=jnp.float32), w1_f)          # (G*D, G*H)
    b1_rep = jnp.tile(b1_f, G).reshape(1, GH)                      # (1, G*H) f32
    w_v = wlin2_f @ w2_f.T                                         # (E, H)
    w_v_rep = jnp.tile(w_v, (1, G))                                # (E, G*H)
    w_c = (wlin2_f @ b2_f).reshape(1, E)                           # (1, E)  f32

    w1_bd = w1_bd.astype(compute_dtype)
    w_v_rep = w_v_rep.astype(compute_dtype)

    # ---- activation packing ------------------------------------------------
    # Batch-major, G packed on the contraction axis: (B, G*D), contiguous DMA.
    cand_packed = jnp.transpose(candidates, (1, 0, 2)).reshape(B, GD)
    if b_pad != B:
        cand_packed = jnp.pad(cand_packed, ((0, b_pad - B), (0, 0)))
        signal = jnp.pad(signal, ((0, b_pad - B), (0, 0)))
    cand_packed = cand_packed.astype(compute_dtype)
    signal = signal.astype(compute_dtype)

    flops = 2 * b_pad * (GD * GH + E * GH + E) + 3 * b_pad * GH
    bytes_accessed = (cand_packed.nbytes + signal.nbytes + w1_bd.nbytes
                      + b1_rep.nbytes + w_v_rep.nbytes + w_c.nbytes
                      + b_pad * G * 4)

    out = pl.pallas_call(
        _receiver_kernel,
        out_shape=jax.ShapeDtypeStruct((b_pad, G), jnp.float32),
        grid=grid,
        in_specs=[
            pl.BlockSpec((tb, GD), lambda i: (i, 0)),   # packed candidates
            pl.BlockSpec((tb, E), lambda i: (i, 0)),    # signal tile
            pl.BlockSpec((GD, GH), lambda i: (0, 0)),   # block-diag W1
            pl.BlockSpec((1, GH), lambda i: (0, 0)),    # b1 (tiled)
            pl.BlockSpec((E, GH), lambda i: (0, 0)),    # Wlin2 @ W2^T (tiled)
            pl.BlockSpec((1, E), lambda i: (0, 0)),     # Wlin2 @ b2
        ],
        out_specs=pl.BlockSpec((tb, G), lambda i: (i, 0)),
        compiler_params=pltpu.CompilerParams(
            dimension_semantics=("parallel",)),
        cost_estimate=pl.CostEstimate(
            flops=flops, transcendentals=0, bytes_accessed=bytes_accessed),
    )(cand_packed, signal, w1_bd, b1_rep, w_v_rep, w_c)

    return out[:B]                                                  # (B, G)


def _reference(signal, candidates, params):
    """Pure-JAX f32 reference (un-hoisted math) for correctness checks."""
    if isinstance(candidates, (list, tuple)):
        candidates = jnp.stack(candidates, axis=0)
    if signal.ndim == 3:
        signal = jnp.squeeze(signal, axis=-1)
    h_s = signal @ params["wlin2"]                                   # (B, H)
    h = jnp.maximum(jnp.einsum("gbd,dh->gbh", candidates, params["w1"])
                    + params["b1"], 0.0)
    embs = jnp.einsum("gbh,hk->gbk", h, params["w2"]) + params["b2"]  # (G,B,H)
    return jnp.einsum("gbh,bh->bg", embs, h_s)                        # (B, G)


if __name__ == "__main__":
    # Small shapes consistent with the module's forward.
    game_size = 4        # G
    batch = 2            # B
    input_dim = 18       # D  (module default)
    hidden_size = 32     # H
    embedding_size = 32  # E

    key = jax.random.PRNGKey(0)
    k_sig, k_cand, k_w1, k_b1, k_w2, k_b2, k_wl2 = jax.random.split(key, 7)

    signal = jax.random.normal(k_sig, (batch, embedding_size), jnp.float32)
    candidates = jax.random.normal(
        k_cand, (game_size, batch, input_dim), jnp.float32)

    params = {
        "w1": 0.1 * jax.random.normal(k_w1, (input_dim, hidden_size), jnp.float32),
        "b1": 0.1 * jax.random.normal(k_b1, (hidden_size,), jnp.float32),
        "w2": 0.1 * jax.random.normal(k_w2, (hidden_size, hidden_size), jnp.float32),
        "b2": 0.1 * jax.random.normal(k_b2, (hidden_size,), jnp.float32),
        "wlin2": 0.1 * jax.random.normal(k_wl2, (embedding_size, hidden_size), jnp.float32),
    }

    ref = _reference(signal, candidates, params)

    # f32 compute path: tight correctness check (hoist is algebraically exact).
    out_f32 = symbolic_receiver_mlp(signal, candidates, params,
                                    compute_dtype=jnp.float32)
    jax.block_until_ready(out_f32)
    assert out_f32.shape == (batch, game_size), out_f32.shape
    assert jnp.allclose(out_f32, ref, atol=1e-3, rtol=1e-3), "f32 mismatch vs reference"

    # bf16 compute path (default; MXU-native on v6e/v7x): looser tolerance.
    out_bf16 = symbolic_receiver_mlp(signal, candidates, params)
    jax.block_until_ready(out_bf16)
    assert out_bf16.shape == (batch, game_size), out_bf16.shape
    assert jnp.allclose(out_bf16, ref, atol=5e-2, rtol=5e-2), "bf16 mismatch vs reference"

    print("KERNEL_OK")
</pallas_src>

<mosaic_0001>
module attributes {stable_mosaic.version = 11 : i64} {
  func.func @_receiver_kernel(%arg0: i32, %arg1: memref<8x72xf32, #tpu.memory_space<vmem>>, %arg2: memref<8x32xf32, #tpu.memory_space<vmem>>, %arg3: memref<72x128xf32, #tpu.memory_space<vmem>>, %arg4: memref<1x128xf32, #tpu.memory_space<vmem>>, %arg5: memref<32x128xf32, #tpu.memory_space<vmem>>, %arg6: memref<1x32xf32, #tpu.memory_space<vmem>>, %arg7: memref<8x4xf32, #tpu.memory_space<vmem>>) attributes {dimension_semantics = [#tpu.dimension_semantics<parallel>], iteration_bounds = array<i64: 1>, scalar_prefetch = 0 : i64, scratch_operands = 0 : i64, tpu.core_type = #tpu.core_type<tc>, window_params = [{transform_indices = @transform_0, window_bounds = array<i64: 8, 72>}, {transform_indices = @transform_1, window_bounds = array<i64: 8, 32>}, {pipeline_mode = #tpu.pipeline_mode<synchronous>, transform_indices = @transform_2, window_bounds = array<i64: 72, 128>}, {pipeline_mode = #tpu.pipeline_mode<synchronous>, transform_indices = @transform_3, window_bounds = array<i64: 1, 128>}, {pipeline_mode = #tpu.pipeline_mode<synchronous>, transform_indices = @transform_4, window_bounds = array<i64: 32, 128>}, {pipeline_mode = #tpu.pipeline_mode<synchronous>, transform_indices = @transform_5, window_bounds = array<i64: 1, 32>}, {transform_indices = @transform_6, window_bounds = array<i64: 8, 4>}]} {
    %c0 = arith.constant 0 : index
    %c0_0 = arith.constant 0 : index
    %0 = vector.load %arg1[%c0, %c0_0] : memref<8x72xf32, #tpu.memory_space<vmem>>, vector<8x72xf32>
    %c0_1 = arith.constant 0 : index
    %c0_2 = arith.constant 0 : index
    %1 = vector.load %arg3[%c0_1, %c0_2] : memref<72x128xf32, #tpu.memory_space<vmem>>, vector<72x128xf32>
    %cst = arith.constant dense<0.000000e+00> : vector<8x128xf32>
    %2 = tpu.matmul %0, %1, %cst {dimension_numbers = #tpu.dot_dimension_numbers<[1], [0], [0], [1], [0, 0, 1, 1], [], []>} : vector<8x72xf32>, vector<72x128xf32>, vector<8x128xf32> -> vector<8x128xf32>
    %c0_3 = arith.constant 0 : index
    %c0_4 = arith.constant 0 : index
    %3 = vector.load %arg4[%c0_3, %c0_4] : memref<1x128xf32, #tpu.memory_space<vmem>>, vector<1x128xf32>
    %4 = vector.broadcast %3 : vector<1x128xf32> to vector<8x128xf32>
    %5 = arith.addf %2, %4 : vector<8x128xf32>
    %cst_5 = arith.constant 0.000000e+00 : f32
    %6 = vector.broadcast %cst_5 : f32 to vector<8x128xf32>
    %7 = arith.maximumf %5, %6 : vector<8x128xf32>
    %c0_6 = arith.constant 0 : index
    %c0_7 = arith.constant 0 : index
    %8 = vector.load %arg2[%c0_6, %c0_7] : memref<8x32xf32, #tpu.memory_space<vmem>>, vector<8x32xf32>
    %c0_8 = arith.constant 0 : index
    %c0_9 = arith.constant 0 : index
    %9 = vector.load %arg5[%c0_8, %c0_9] : memref<32x128xf32, #tpu.memory_space<vmem>>, vector<32x128xf32>
    %cst_10 = arith.constant dense<0.000000e+00> : vector<8x128xf32>
    %10 = tpu.matmul %8, %9, %cst_10 {dimension_numbers = #tpu.dot_dimension_numbers<[1], [0], [0], [1], [0, 0, 1, 1], [], []>} : vector<8x32xf32>, vector<32x128xf32>, vector<8x128xf32> -> vector<8x128xf32>
    %c0_11 = arith.constant 0 : index
    %c0_12 = arith.constant 0 : index
    %11 = vector.load %arg2[%c0_11, %c0_12] : memref<8x32xf32, #tpu.memory_space<vmem>>, vector<8x32xf32>
    %c0_13 = arith.constant 0 : index
    %c0_14 = arith.constant 0 : index
    %12 = vector.load %arg6[%c0_13, %c0_14] : memref<1x32xf32, #tpu.memory_space<vmem>>, vector<1x32xf32>
    %13 = vector.broadcast %12 : vector<1x32xf32> to vector<8x32xf32>
    %14 = arith.mulf %11, %13 : vector<8x32xf32>
    %cst_15 = arith.constant dense<0.000000e+00> : vector<8xf32>
    %15 = vector.multi_reduction <add>, %14, %cst_15 [1] : vector<8x32xf32> to vector<8xf32>
    %16 = vector.shape_cast %15 : vector<8xf32> to vector<8x1xf32>
    %17 = arith.mulf %7, %10 : vector<8x128xf32>
    %18 = vector.extract_strided_slice %17 {offsets = [0, 0], sizes = [8, 32], strides = [1, 1]} : vector<8x128xf32> to vector<8x32xf32>
    %cst_16 = arith.constant dense<0.000000e+00> : vector<8xf32>
    %19 = vector.multi_reduction <add>, %18, %cst_16 [1] : vector<8x32xf32> to vector<8xf32>
    %20 = vector.shape_cast %19 : vector<8xf32> to vector<8x1xf32>
    %21 = vector.extract_strided_slice %17 {offsets = [0, 32], sizes = [8, 32], strides = [1, 1]} : vector<8x128xf32> to vector<8x32xf32>
    %cst_17 = arith.constant dense<0.000000e+00> : vector<8xf32>
    %22 = vector.multi_reduction <add>, %21, %cst_17 [1] : vector<8x32xf32> to vector<8xf32>
    %23 = vector.shape_cast %22 : vector<8xf32> to vector<8x1xf32>
    %24 = vector.extract_strided_slice %17 {offsets = [0, 64], sizes = [8, 32], strides = [1, 1]} : vector<8x128xf32> to vector<8x32xf32>
    %cst_18 = arith.constant dense<0.000000e+00> : vector<8xf32>
    %25 = vector.multi_reduction <add>, %24, %cst_18 [1] : vector<8x32xf32> to vector<8xf32>
    %26 = vector.shape_cast %25 : vector<8xf32> to vector<8x1xf32>
    %27 = vector.extract_strided_slice %17 {offsets = [0, 96], sizes = [8, 32], strides = [1, 1]} : vector<8x128xf32> to vector<8x32xf32>
    %cst_19 = arith.constant dense<0.000000e+00> : vector<8xf32>
    %28 = vector.multi_reduction <add>, %27, %cst_19 [1] : vector<8x32xf32> to vector<8xf32>
    %29 = vector.shape_cast %28 : vector<8xf32> to vector<8x1xf32>
    %30 = tpu.concatenate %20, %23, %26, %29 in 1 : vector<8x1xf32>, vector<8x1xf32>, vector<8x1xf32>, vector<8x1xf32> -> vector<8x4xf32>
    %31 = vector.broadcast %16 : vector<8x1xf32> to vector<8x4xf32>
    %32 = arith.addf %30, %31 : vector<8x4xf32>
    %c0_20 = arith.constant 0 : index
    %c0_21 = arith.constant 0 : index
    %33 = vector.load %arg7[%c0_20, %c0_21] : memref<8x4xf32, #tpu.memory_space<vmem>>, vector<8x4xf32>
    tpu.vector_store %arg7[%c0_20, %c0_21], %32 {strides = array<i32>} : memref<8x4xf32, #tpu.memory_space<vmem>>, vector<8x4xf32>,
    return
  }
  func.func @transform_0(%arg0: i32) -> (i32, i32) {
    %c0_i32 = arith.constant 0 : i32
    %c0_i32_0 = arith.constant 0 : i32
    return %arg0, %c0_i32 : i32, i32
  }
  func.func @transform_1(%arg0: i32) -> (i32, i32) {
    %c0_i32 = arith.constant 0 : i32
    %c0_i32_0 = arith.constant 0 : i32
    return %arg0, %c0_i32 : i32, i32
  }
  func.func @transform_2(%arg0: i32) -> (i32, i32) {
    %c0_i32 = arith.constant 0 : i32
    %c0_i32_0 = arith.constant 0 : i32
    %c0_i32_1 = arith.constant 0 : i32
    return %c0_i32, %c0_i32_0 : i32, i32
  }
  func.func @transform_3(%arg0: i32) -> (i32, i32) {
    %c0_i32 = arith.constant 0 : i32
    %c0_i32_0 = arith.constant 0 : i32
    %c0_i32_1 = arith.constant 0 : i32
    return %c0_i32, %c0_i32_0 : i32, i32
  }
  func.func @transform_4(%arg0: i32) -> (i32, i32) {
    %c0_i32 = arith.constant 0 : i32
    %c0_i32_0 = arith.constant 0 : i32
    %c0_i32_1 = arith.constant 0 : i32
    return %c0_i32, %c0_i32_0 : i32, i32
  }
  func.func @transform_5(%arg0: i32) -> (i32, i32) {
    %c0_i32 = arith.constant 0 : i32
    %c0_i32_0 = arith.constant 0 : i32
    %c0_i32_1 = arith.constant 0 : i32
    return %c0_i32, %c0_i32_0 : i32, i32
  }
  func.func @transform_6(%arg0: i32) -> (i32, i32) {
    %c0_i32 = arith.constant 0 : i32
    %c0_i32_0 = arith.constant 0 : i32
    return %arg0, %c0_i32 : i32, i32
  }
}

</mosaic_0001>

<bundles_post_ra>
// kernel: tpu_custom_call.1
= control target key start
LH: loop header
LB: loop body
LE: loop exit
PB: predicated region body
PF: predicated region fallthrough
CT: control target
= control target key end

     0   :  { %11 = vsyncpa [#allocation3], 0  ;;  %s580_s0 = inlined_call_operand.hbm [shape: f32[8,72], index: 0, kind: input, shape index: {}]   ;;  %s581_s1 = inlined_call_operand.hbm [shape: f32[8,32], index: 1, kind: input, shape index: {}]   ;;  %s582_s2 = inlined_call_operand.hbm [shape: f32[72,128], index: 2, kind: input, shape index: {}]   ;;  %s583_s3 = inlined_call_operand.vmem [shape: f32[1,128], index: 3, kind: input, shape index: {}]   ;;  %s584_s4 = inlined_call_operand.hbm [shape: f32[32,128], index: 4, kind: input, shape index: {}]   ;;  %s585_s5 = inlined_call_operand.vmem [shape: f32[1,32], index: 5, kind: input, shape index: {}]   ;;  %s586_s6 = inlined_call_operand.vmem [shape: f32[8,4], index: 6, kind: output, shape index: {}]  }
   0x1   :  { %12 = vsyncpa [#allocation5], 0 }
   0x2   :  { %13 = vsyncpa [#allocation8], 0  ;;  %s470_s21 = smov [#allocation4]   ;;  %s471_s23 = smov [#allocation2]  }
   0x3   :  { %s30_s22 = sshll.u32 %s470_s21, 4  ;;  %s20_s24 = sshll.u32 %s471_s23, 4  ;;  %s31_s22 = int_to_ptr.vmem [resolvable:$true] %s30_s22  ;;  %s21_s24 = int_to_ptr.vmem [resolvable:$true] %s20_s24 }
   0x4   :  { %s376_s27 = scalar_lea.hbm %s581_s1, 128 }
   0x5   :  { %p377_p0 = scmp.ne.s32.totalorder %s581_s1, %s376_s27  ;;  %p380_p1 = scmp.lt.u32.totalorder %s376_s27, %s581_s1 }
   0x7   :  { %p382_p2 = pnand %p380_p1, %p377_p0 }
   0x9   :  { %385 = shalt.err (!%p382_p2)
}
   0xa   :  { %s386_s8 = scalar_lea.vmem %s31_s22, 128  ;;  %p391_p4 = scmp.lt.s32.totalorder %s31_s22, %s31_s22 }
   0xb   :  { %p387_p3 = scmp.ne.s32.totalorder %s31_s22, %s386_s8  ;;  %p392_p5 = scmp.lt.s32.totalorder %s386_s8, %s386_s8 }
   0xd   :  { %p393_p6 = por %p392_p5, %p391_p4 }
   0xf   :  { %p394_p7 = pnand %p393_p6, %p387_p3 }
  0x11   :  { %397 = shalt.err (!%p394_p7)
}
  0x12   :  { %33 = dma.hbm_to_vmem [thread:$0]  %s581_s1, 128, %s31_s22, [#allocation5]  }
  0x13   :  { %s398_s13 = scalar_lea.hbm %s580_s0, 128 }
  0x14   :  { %p399_p8 = scmp.ne.s32.totalorder %s580_s0, %s398_s13  ;;  %p402_p9 = scmp.lt.u32.totalorder %s398_s13, %s580_s0 }
  0x16   :  { %p404_p10 = pnand %p402_p9, %p399_p8 }
  0x18   :  { %407 = shalt.err (!%p404_p10)
}
  0x19   :  { %s408_s18 = scalar_lea.vmem %s21_s24, 128  ;;  %p413_p12 = scmp.lt.s32.totalorder %s21_s24, %s21_s24 }
  0x1a   :  { %p409_p11 = scmp.ne.s32.totalorder %s21_s24, %s408_s18  ;;  %p414_p13 = scmp.lt.s32.totalorder %s408_s18, %s408_s18 }
  0x1c   :  { %p415_p0 = por %p414_p13, %p413_p12 }
  0x1e   :  { %p416_p1 = pnand %p415_p0, %p409_p11 }
  0x20   :  { %419 = shalt.err (!%p416_p1)
}
  0x21   :  { %23 = dma.hbm_to_vmem [thread:$0]  %s580_s0, 128, %s21_s24, [#allocation3]  }
  0x22   :  { %s472_s20 = smov [#allocation6]   ;;  %s420_s25 = scalar_lea.hbm %s582_s2, 1152 }
  0x23   :  { %s39_s21 = sshll.u32 %s472_s20, 4  ;;  %p421_p2 = scmp.ne.s32.totalorder %s582_s2, %s420_s25  ;;  %s40_s21 = int_to_ptr.vmem [resolvable:$true] %s39_s21 }
  0x24   :  { %p424_p3 = scmp.lt.u32.totalorder %s420_s25, %s582_s2 }
  0x26   :  { %p426_p4 = pnand %p424_p3, %p421_p2 }
  0x28   :  { %429 = shalt.err (!%p426_p4)
}
  0x29   :  { %s430_s30 = scalar_lea.vmem %s40_s21, 1152  ;;  %p435_p6 = scmp.lt.s32.totalorder %s40_s21, %s40_s21 }
  0x2a   :  { %p431_p5 = scmp.ne.s32.totalorder %s40_s21, %s430_s30  ;;  %p436_p7 = scmp.lt.s32.totalorder %s430_s30, %s430_s30 }
  0x2c   :  { %p437_p8 = por %p436_p7, %p435_p6 }
  0x2e   :  { %p438_p9 = pnand %p437_p8, %p431_p5 }
  0x30   :  { %441 = shalt.err (!%p438_p9)
}
  0x31   :  { %s473_s0 = smov 128   ;;  %s474_s24 = smov 8  }
  0x32   :  { %45 = dma.hbm_to_vmem [thread:$0]  %s582_s2, 1152, %s40_s21, [#allocation5], %s473_s0, %s473_s0, %s474_s24  }
  0x33   :  { %s475_s9 = smov [#allocation7]   ;;  %s442_s13 = scalar_lea.hbm %s584_s4, 512 }
  0x34   :  { %s53_s10 = sshll.u32 %s475_s9, 4  ;;  %p443_p10 = scmp.ne.s32.totalorder %s584_s4, %s442_s13  ;;  %s54_s10 = int_to_ptr.vmem [resolvable:$true] %s53_s10 }
  0x35   :  { %p446_p11 = scmp.lt.u32.totalorder %s442_s13, %s584_s4 }
  0x37   :  { %p448_p12 = pnand %p446_p11, %p443_p10 }
  0x39   :  { %451 = shalt.err (!%p448_p12)
}
  0x3a   :  { %s452_s18 = scalar_lea.vmem %s54_s10, 512  ;;  %p457_p0 = scmp.lt.s32.totalorder %s54_s10, %s54_s10 }
  0x3b   :  { %p453_p13 = scmp.ne.s32.totalorder %s54_s10, %s452_s18  ;;  %p458_p1 = scmp.lt.s32.totalorder %s452_s18, %s452_s18 }
  0x3d   :  { %p459_p2 = por %p458_p1, %p457_p0 }
  0x3f   :  { %p460_p3 = pnand %p459_p2, %p453_p13 }
  0x41   :  { %463 = shalt.err (!%p460_p3)
}
  0x42   :  { %59 = dma.hbm_to_vmem [thread:$0]  %s584_s4, 512, %s54_s10, [#allocation8], %s473_s0, %s473_s0, %s474_s24  }
  0x43   :  { %464 = dma.done.wait [#allocation3], 128  }
  0x44   :  { %465 = vsyncadd [#allocation3], 4294967168 }
  0x45   :  { %466 = dma.done.wait [#allocation5], 1280  }
  0x46   :  { %467 = vsyncadd [#allocation5], 4294966016 }
  0x47   :  { %468 = dma.done.wait [#allocation8], 512  }
  0x48   :  { %469 = vsyncadd [#allocation8], 4294966784  ;;  %v476_v0 = vmov 0.0|0.0   ;;  %vm477_vm0 = vmmov 0   ;;  %v478_v1 = vmov 0.0   ;;  %v75_v2 = vld [vmem:[#allocation6] sm:$0xff] }
  0x49   :  { %346 = vmatprep.subr.bf16.mxu0 %v476_v0  ;;  %358 = vmatprep.subr.bf16.mxu1 %v476_v0  ;;  %v76_v3 = vld [vmem:[#allocation6 + $0x8] sm:$0xff]  ;;  %v77_v4 = vld [vmem:[#allocation6 + $0x10] sm:$0xff]  ;;  %v78_v6 = vld [vmem:[#allocation6 + $0x18] sm:$0xff]  ;;  %vm171_vm1 = vcmask 261120   ;;  %vm91_vm2 = vcmask 588800   ;;  %s479_s20 = smov 32  }
  0x4a   :  { %332 = vmatprep.mubr.msk.f32.mxu0 %vm477_vm0, %v478_v1  ;;  %343 = vmatprep.mubr.msk.f32.mxu1 %vm477_vm0, %v478_v1  ;;  %v347_v5 = vpack.c.bf16 %v76_v3, %v75_v2  ;;  %v167_v7 = vld [vmem:[#allocation7] sm:$0xff]  ;;  %v350_v8 = vpack.c.bf16 %v78_v6, %v77_v4  ;;  %v79_v9 = vld [vmem:[#allocation6 + $0x20] sm:$0xff]  ;;  %v168_v10 = vld [vmem:[#allocation7 + $0x8] sm:$0xff]  ;;  %s480_s21 = smov 96   ;;  %s481_s22 = smov 64   ;;  %vm279_vm3 = vcmask 7168  }
  0x4b   :  { %v80_v11 = vld [vmem:[#allocation6 + $0x28] sm:$0xff]  ;;  %v359_v12 = vpack.c.bf16 %v168_v10, %v167_v7  ;;  %v169_v13 = vld [vmem:[#allocation7 + $0x10] sm:$0xff]  ;;  %v170_v14 = vld [vmem:[#allocation7 + $0x18] sm:$0xff]  ;;  %vm281_vm4 = vcmask 15360   ;;  %vm283_vm5 = vcmask 23552   ;;  %vm286_vm6 = vcmask 31744  }
  0x4c   :  { %348 = vmatpush3.bf16.msra.mxu0 %v347_v5  ;;  %v362_v15 = vpack.c.bf16 %v170_v14, %v169_v13  ;;  %v353_v16 = vpack.c.bf16 %v80_v11, %v79_v9  ;;  %v81_v17 = vld [vmem:[#allocation6 + $0x30] sm:$0xff]  ;;  %v82_v18 = vld [vmem:[#allocation6 + $0x38] sm:$0xff]  ;;  %v83_v21 = vld [vmem:[#allocation6 + $0x40] sm:$0xff] }
  0x4d   :  { %349 = vmatprep.subr.bf16.mxu0 %v476_v0  ;;  %360 = vmatpush3.bf16.msra.mxu1 %v359_v12  ;;  %v166_v19 = vld [vmem:[#allocation4] sm:$0xff]  ;;  %v356_v20 = vpack.c.bf16 %v82_v18, %v81_v17  ;;  %v74_v22 = vld [vmem:[#allocation2] sm:$0xff] }
  0x4e   :  { %361 = vmatprep.subr.bf16.mxu1 %v476_v0  ;;  %v295_v25 = vld [vmem:[%s583_s3] ss:$0 sm:$0xff] }
  0x4f   :  { %v298_v31 = vld [vmem:[%s585_s5] ss:$0 sm:$0xff] }
  0x50   :  { %351 = vmatpush3.bf16.msra.mxu0 %v350_v8  ;;  %v252_v32 = vmul.f32 %v298_v31, %v166_v19 }
  0x51   :  { %352 = vmatprep.subr.bf16.mxu0 %v476_v0  ;;  %363 = vmatpush3.bf16.msra.mxu1 %v362_v15 }
  0x52   :  { %v253_v33 = vsel %vm171_vm1, %v252_v32, 0.0 }
  0x54   :  { %354 = vmatpush3.bf16.msra.mxu0 %v353_v16  ;;  %344 = vmatmul.mubr.msk.f32.vlgmr.msra.gmra.mrb[0].mxu1 %vm171_vm1, %v166_v19 }
  0x55   :  { %355 = vmatprep.subr.bf16.mxu0 %v476_v0 }
  0x58   :  { %357 = vmatpush3.bf16.msra.mxu0 %v356_v20 }
  0x59   :  { %330 = vmatprep.subr.mxu0 %v478_v1 }
  0x5c   :  { %331 = vmatpush3.msra.mxu0 %v83_v21 }
  0x5d   :  { %333 = vmatmul.mubr.msk.f32.vlgmr.msra.gmra.mrb[0].mxu0 %vm91_vm2, %v74_v22 }
 0x127   :  { %v241_v23 = vpop.f32.mrb[0].mxu1 }
 0x128   :  { %v345_v24 = vpop.f32.mrb[1].mxu1 }
 0x130   :  { %v161_v26 = vpop.f32.mrb[0].mxu0 }
 0x131   :  { %v162_v27 = vadd.f32 %v295_v25, %v161_v26  ;;  %v334_v28 = vpop.f32.mrb[1].mxu0 }
 0x133   :  { %v165_v29 = vmax.f32 %v162_v27, 0.0 }
 0x135   :  { %v256_v30 = vmul.f32 %v241_v23, %v165_v29 }
 0x137   :  { %273 = vrot.lane.b32.xlu1 %v256_v30, %s479_s20  ;;  %261 = vrot.lane.b32.xlu0 %v256_v30, %s480_s21  ;;  %v257_v34 = vsel %vm171_vm1, %v256_v30, 0.0 }
 0x13b   :  { %267 = vrot.lane.b32.xlu0 %v256_v30, %s481_s22 }
 0x15a   :  { %258 = vadd.xlane.f32.xlu0 %v257_v34 }
 0x15b   :  { %254 = vadd.xlane.f32.xlu1 %v253_v33 }
 0x1a9   :  { %v262_v35 = vpop.permute.xlu0 %261  ;;  %v274_v37 = vpop.permute.xlu1 %273 }
 0x1aa   :  { %v264_v36 = vsel %vm171_vm1, %v262_v35, 0.0  ;;  %v276_v40 = vsel %vm171_vm1, %v274_v37, 0.0 }
 0x1ab   :  { %265 = vadd.xlane.f32.xlu0 %v264_v36 }
 0x1ad   :  { %v268_v38 = vpop.permute.xlu0 %267 }
 0x1ae   :  { %v270_v39 = vsel %vm171_vm1, %v268_v38, 0.0 }
 0x1af   :  { %271 = vadd.xlane.f32.xlu1 %v270_v39  ;;  %277 = vadd.xlane.f32.xlu0 %v276_v40 }
 0x1e7   :  { %v259_v41 = vpop.xlane.xlu0 %258 }
 0x1e8   :  { %v255_v42 = vpop.xlane.xlu1 %254 }
 0x238   :  { %v266_v43 = vpop.xlane.xlu0 %265 }
 0x239   :  { %v280_v44 = vsel %vm279_vm3, %v259_v41, %v266_v43 }
 0x23c   :  { %v272_v45 = vpop.xlane.xlu1 %271  ;;  %v278_v46 = vpop.xlane.xlu0 %277 }
 0x23d   :  { %v282_v47 = vsel %vm281_vm4, %v280_v44, %v272_v45 }
 0x23e   :  { %v284_v48 = vsel %vm283_vm5, %v282_v47, %v278_v46 }
 0x23f   :  { %v285_v49 = vadd.f32 %v284_v48, %v255_v42 }
 0x241   :  { %287 = vst.msk [vmem:[%s586_s6] sm:$0xff] %vm286_vm6, %v285_v49 }
 0x242   :  { %292 = vsyncpa [#allocation3], 1 }
 0x243   :  { %293 = vsyncpa [#allocation5], 1 }
 0x244   :  { %294 = vsyncpa [#allocation8], 1 }

</bundles_post_ra>
